<compile_context>
chip_gen: v7x
topology: tpu7x:2x2x1
jax: 0.10.0
libtpu: 0.0.40
codegen_flags: <defaults>
</compile_context>

<pallas_src>
import functools
import math

import jax
import jax.numpy as jnp
from jax.experimental import pallas as pl
from jax.experimental.pallas import tpu as pltpu


def _round_up(x: int, m: int) -> int:
    return (x + m - 1) // m * m


# ---------------------------------------------------------------------------
# Parameter construction (matches torch / torchaudio defaults: periodic hann,
# htk mel scale, norm=None, f_min=0, f_max=sr//2)
# ---------------------------------------------------------------------------

def hann_window_periodic(n: int) -> jnp.ndarray:
    i = jnp.arange(n, dtype=jnp.float32)
    return 0.5 * (1.0 - jnp.cos(2.0 * math.pi * i / n))


def _hz_to_mel_htk(f):
    return 2595.0 * jnp.log10(1.0 + f / 700.0)


def _mel_to_hz_htk(m):
    return 700.0 * (jnp.power(10.0, m / 2595.0) - 1.0)


def melscale_fbanks(n_freqs: int, f_min: float, f_max: float, n_mels: int,
                    sample_rate: int) -> jnp.ndarray:
    """Equivalent of torchaudio.functional.melscale_fbanks (htk, norm=None)."""
    all_freqs = jnp.linspace(0.0, sample_rate // 2, n_freqs)
    m_min = _hz_to_mel_htk(f_min)
    m_max = _hz_to_mel_htk(f_max)
    m_pts = jnp.linspace(m_min, m_max, n_mels + 2)
    f_pts = _mel_to_hz_htk(m_pts)
    f_diff = f_pts[1:] - f_pts[:-1]                       # (n_mels + 1,)
    slopes = f_pts[None, :] - all_freqs[:, None]          # (n_freqs, n_mels + 2)
    down = -slopes[:, :-2] / f_diff[:-1]
    up = slopes[:, 2:] / f_diff[1:]
    fb = jnp.maximum(0.0, jnp.minimum(down, up))          # (n_freqs, n_mels)
    return fb.astype(jnp.float32)


def fused_dft_matrix_t(n_fft: int, n_freqs: int, n_freq_pad: int) -> jnp.ndarray:
    """(2*n_freq_pad, n_fft) matrix W so that W @ frames_T = [Re; Im].

    Rows [0, n_freqs)            : window * cos(2*pi*n*k/n_fft)
    Rows [n_freq_pad, +n_freqs)  : -window * sin(...)
    Frequency padding rows are zero (padded freq bins contribute nothing to
    the zero-padded mel matrix either).
    """
    window = hann_window_periodic(n_fft)                       # (n_fft,)
    n = jnp.arange(n_fft, dtype=jnp.float32)[None, :]          # (1, n_fft)
    k = jnp.arange(n_freqs, dtype=jnp.float32)[:, None]        # (n_freqs, 1)
    ang = 2.0 * math.pi * k * n / n_fft
    cos_t = window[None, :] * jnp.cos(ang)                     # (n_freqs, n_fft)
    sin_t = -window[None, :] * jnp.sin(ang)
    w = jnp.zeros((2 * n_freq_pad, n_fft), jnp.float32)
    w = w.at[:n_freqs, :].set(cos_t)
    w = w.at[n_freq_pad:n_freq_pad + n_freqs, :].set(sin_t)
    return w


def mel_matrix_t(n_freqs: int, n_mels: int, n_freq_pad: int, n_mels_pad: int,
                 f_min: float, f_max: float, sample_rate: int) -> jnp.ndarray:
    """(n_mels_pad, n_freq_pad) transposed, zero-padded mel filterbank (f32)."""
    fb = melscale_fbanks(n_freqs, f_min, f_max, n_mels, sample_rate)
    m = jnp.zeros((n_mels_pad, n_freq_pad), jnp.float32)
    m = m.at[:n_mels, :n_freqs].set(fb.T)
    return m


# ---------------------------------------------------------------------------
# Pallas kernel: one (batch, frame-tile) block per grid step.
#   frames_t_ref: (1, n_fft, TILE_T)          compute dtype (bf16 or f32)
#   w_ref:        (2*n_freq_pad, n_fft)       compute dtype, fused cos/sin DFT
#   mel_t_ref:    (n_mels_pad, n_freq_pad)    f32 (accuracy: mel matmul in f32)
#   out_ref:      (1, n_mels_pad, TILE_T)     f32, lane-dense store (TILE_T lanes)
# ---------------------------------------------------------------------------

def _logmel_kernel(frames_t_ref, w_ref, mel_t_ref, out_ref, *, n_freq_pad,
                   log_eps):
    frames_t = frames_t_ref[0]                                  # (n_fft, TILE_T)
    # Single fused DFT matmul: rows [0:nfp) are Re, rows [nfp:2nfp) are Im.
    spec = jnp.dot(w_ref[...], frames_t,
                   preferred_element_type=jnp.float32)          # (2*nfp, TILE_T) f32
    re = spec[:n_freq_pad, :]
    im = spec[n_freq_pad:, :]
    power = re * re + im * im                                   # |STFT|**2 (power=2.0)
    # Mel matmul stays in f32 (tiny FLOP fraction; avoids bf16 rounding of the
    # power spectrum that log() would amplify near spectral nulls).
    mel = jnp.dot(mel_t_ref[...], power,
                  preferred_element_type=jnp.float32)           # (n_mels_pad, TILE_T)
    out_ref[0] = jnp.log(mel + log_eps)


# ---------------------------------------------------------------------------
# Framing glue (XLA): reflect pad + overlapping frame gather, transposed so
# time is the lane dim of the kernel input and output.
# ---------------------------------------------------------------------------

def _frame_signal_t(x: jnp.ndarray, n_fft: int, hop: int, t_pad: int,
                    dtype) -> jnp.ndarray:
    """Center (reflect) padding + framing, like torch.stft(center=True).

    Returns frames_T of shape (B, n_fft, t_pad).  Frame columns beyond the
    real frame count read zero padding (their output columns are discarded by
    the wrapper's final slice).
    """
    pad = n_fft // 2
    xp = jnp.pad(x.astype(jnp.float32), ((0, 0), (pad, pad)), mode="reflect")
    need = (t_pad - 1) * hop + n_fft
    extra = max(0, need - xp.shape[1])
    xp = jnp.pad(xp, ((0, 0), (0, extra)))
    xp = xp.astype(dtype)
    idx = (jnp.arange(n_fft)[:, None]
           + hop * jnp.arange(t_pad)[None, :])                  # (n_fft, t_pad)
    return xp[:, idx]                                           # (B, n_fft, t_pad)


def _pick_tile_t(n_frames: int, batch: int) -> int:
    """Largest tile in {128,256,512,1024} with bounded padding waste, then
    shrunk (if possible) so the parallel grid has >=2 points (v7x megacore)."""
    t128 = _round_up(n_frames, 128)
    tile_t = 128
    for cand in (256, 512, 1024):
        if cand <= t128 and _round_up(n_frames, cand) - t128 <= cand // 2:
            tile_t = cand
    while tile_t > 128 and batch * (_round_up(n_frames, tile_t) // tile_t) < 2:
        tile_t //= 2
    return tile_t


@functools.partial(jax.jit, static_argnames=("n_fft", "hop_length", "n_mels",
                                             "samplerate", "compute_dtype"))
def log_mel_filterbanks(x: jnp.ndarray, *, n_fft: int = 400,
                        hop_length: int = 160, n_mels: int = 80,
                        samplerate: int = 16000,
                        compute_dtype=jnp.bfloat16) -> jnp.ndarray:
    """Forward pass of LogMelFilterBanks.

    Args:
      x: (batch, time) float32 audio.
    Returns:
      (batch, n_mels, n_frames) float32 log-mel spectrogram.
    """
    n_freqs = n_fft // 2 + 1
    n_freq_pad = _round_up(n_freqs, 128)         # 201 -> 256
    n_mels_pad = _round_up(n_mels, 8)            # sublane dim of output -> 80
    assert n_fft % 8 == 0, "n_fft must be sublane aligned (multiple of 8)"

    B, time = x.shape
    n_frames = 1 + time // hop_length            # center=True
    tile_t = _pick_tile_t(n_frames, B)
    t_pad = _round_up(n_frames, tile_t)

    frames_t = _frame_signal_t(x, n_fft, hop_length, t_pad,
                               compute_dtype)    # (B, n_fft, t_pad)
    w_t = fused_dft_matrix_t(n_fft, n_freqs, n_freq_pad).astype(compute_dtype)
    mel_t = mel_matrix_t(n_freqs, n_mels, n_freq_pad, n_mels_pad, 0.0,
                         samplerate // 2, samplerate)           # stays f32

    kernel = functools.partial(_logmel_kernel, n_freq_pad=n_freq_pad,
                               log_eps=1e-6)

    grid = (B, t_pad // tile_t)
    itemsize = jnp.dtype(compute_dtype).itemsize
    flops = 2 * B * t_pad * (n_fft * 2 * n_freq_pad + n_freq_pad * n_mels_pad)
    bytes_accessed = (B * n_fft * t_pad * itemsize
                      + w_t.size * itemsize + mel_t.size * 4
                      + B * n_mels_pad * t_pad * 4)

    out = pl.pallas_call(
        kernel,
        out_shape=jax.ShapeDtypeStruct((B, n_mels_pad, t_pad), jnp.float32),
        grid_spec=pltpu.PrefetchScalarGridSpec(
            num_scalar_prefetch=0,
            grid=grid,
            in_specs=[
                pl.BlockSpec((1, n_fft, tile_t), lambda b, t: (b, 0, t)),
                pl.BlockSpec((2 * n_freq_pad, n_fft), lambda b, t: (0, 0)),
                pl.BlockSpec((n_mels_pad, n_freq_pad), lambda b, t: (0, 0)),
            ],
            out_specs=pl.BlockSpec((1, n_mels_pad, tile_t),
                                   lambda b, t: (b, 0, t)),
        ),
        compiler_params=pltpu.CompilerParams(
            dimension_semantics=("parallel", "parallel")),
        cost_estimate=pl.CostEstimate(flops=flops,
                                      transcendentals=B * n_mels_pad * t_pad,
                                      bytes_accessed=bytes_accessed),
    )(frames_t, w_t, mel_t)

    # Output is already (batch, n_mels_pad, t_pad); just strip padding.
    return out[:, :n_mels, :n_frames]


# ---------------------------------------------------------------------------
# Pure-JAX reference (same math, no Pallas, parameterized by compute dtype so
# the bf16 kernel path can be checked against an identically-quantized ref;
# power / mel matmul stay f32 to mirror the kernel).
# ---------------------------------------------------------------------------

def _reference(x, *, n_fft=400, hop_length=160, n_mels=80, samplerate=16000,
               compute_dtype=jnp.float32):
    n_freqs = n_fft // 2 + 1
    pad = n_fft // 2
    xp = jnp.pad(x.astype(jnp.float32), ((0, 0), (pad, pad)), mode="reflect")
    n_frames = 1 + (xp.shape[1] - n_fft) // hop_length
    idx = (jnp.arange(n_frames)[:, None] * hop_length
           + jnp.arange(n_fft)[None, :])
    frames = xp.astype(compute_dtype)[:, idx]                   # (B, T, n_fft)
    window = hann_window_periodic(n_fft)
    n = jnp.arange(n_fft, dtype=jnp.float32)[:, None]
    k = jnp.arange(n_freqs, dtype=jnp.float32)[None, :]
    ang = 2.0 * math.pi * n * k / n_fft
    cos_m = (window[:, None] * jnp.cos(ang)).astype(compute_dtype)
    sin_m = (-window[:, None] * jnp.sin(ang)).astype(compute_dtype)
    fb = melscale_fbanks(n_freqs, 0.0, samplerate // 2, n_mels,
                         samplerate)                            # f32
    re = jnp.einsum("btn,nf->btf", frames, cos_m,
                    preferred_element_type=jnp.float32)
    im = jnp.einsum("btn,nf->btf", frames, sin_m,
                    preferred_element_type=jnp.float32)
    power = re * re + im * im                                   # f32
    mel = jnp.einsum("btf,fm->btm", power, fb,
                     preferred_element_type=jnp.float32)
    return jnp.transpose(jnp.log(mel + 1e-6), (0, 2, 1))


if __name__ == "__main__":
    key = jax.random.PRNGKey(0)
    batch, time = 2, 1600                                   # -> n_frames = 11
    x = jax.random.normal(key, (batch, time), dtype=jnp.float32)
    n_frames = time // 160 + 1

    # f32 path: tight check against the f32 reference.
    out_f32 = jax.block_until_ready(
        log_mel_filterbanks(x, compute_dtype=jnp.float32))
    ref_f32 = jax.block_until_ready(_reference(x, compute_dtype=jnp.float32))
    assert out_f32.shape == (batch, 80, n_frames), out_f32.shape
    assert jnp.allclose(out_f32, ref_f32, atol=2e-3, rtol=2e-3), \
        "f32 kernel mismatch vs reference"

    # bf16-input / f32-accumulate path (default): check against an
    # identically-quantized reference (isolates kernel structure from bf16
    # quantization noise, which log() can amplify near spectral nulls).
    out_bf16 = jax.block_until_ready(
        log_mel_filterbanks(x, compute_dtype=jnp.bfloat16))
    ref_bf16 = jax.block_until_ready(_reference(x, compute_dtype=jnp.bfloat16))
    assert out_bf16.shape == (batch, 80, n_frames), out_bf16.shape
    assert jnp.allclose(out_bf16, ref_bf16, atol=3e-2, rtol=3e-2), \
        "bf16 kernel mismatch vs bf16 reference"

    print("KERNEL_OK")
</pallas_src>

<mosaic_0001>
module attributes {stable_mosaic.version = 11 : i64} {
  func.func @_logmel_kernel(%arg0: i32, %arg1: i32, %arg2: memref<1x400x128xf32, #tpu.memory_space<vmem>>, %arg3: memref<512x400xf32, #tpu.memory_space<vmem>>, %arg4: memref<80x256xf32, #tpu.memory_space<vmem>>, %arg5: memref<1x80x128xf32, #tpu.memory_space<vmem>>) attributes {dimension_semantics = [#tpu.dimension_semantics<parallel>, #tpu.dimension_semantics<parallel>], iteration_bounds = array<i64: 2, 1>, scalar_prefetch = 0 : i64, scratch_operands = 0 : i64, tpu.core_type = #tpu.core_type<tc>, window_params = [{transform_indices = @transform_0, window_bounds = array<i64: 1, 400, 128>}, {pipeline_mode = #tpu.pipeline_mode<synchronous>, transform_indices = @transform_1, window_bounds = array<i64: 512, 400>}, {pipeline_mode = #tpu.pipeline_mode<synchronous>, transform_indices = @transform_2, window_bounds = array<i64: 80, 256>}, {transform_indices = @transform_3, window_bounds = array<i64: 1, 80, 128>}]} {
    %c0 = arith.constant 0 : index
    %c0_0 = arith.constant 0 : index
    %c0_1 = arith.constant 0 : index
    %0 = vector.load %arg2[%c0, %c0_0, %c0_1] : memref<1x400x128xf32, #tpu.memory_space<vmem>>, vector<1x400x128xf32>
    %1 = vector.shape_cast %0 : vector<1x400x128xf32> to vector<400x128xf32>
    %c0_2 = arith.constant 0 : index
    %c0_3 = arith.constant 0 : index
    %2 = vector.load %arg3[%c0_2, %c0_3] : memref<512x400xf32, #tpu.memory_space<vmem>>, vector<512x400xf32>
    %cst = arith.constant dense<0.000000e+00> : vector<512x128xf32>
    %3 = tpu.matmul %2, %1, %cst {dimension_numbers = #tpu.dot_dimension_numbers<[1], [0], [0], [1], [0, 0, 1, 1], [], []>} : vector<512x400xf32>, vector<400x128xf32>, vector<512x128xf32> -> vector<512x128xf32>
    %4 = vector.extract_strided_slice %3 {offsets = [0, 0], sizes = [256, 128], strides = [1, 1]} : vector<512x128xf32> to vector<256x128xf32>
    %5 = vector.extract_strided_slice %3 {offsets = [256, 0], sizes = [256, 128], strides = [1, 1]} : vector<512x128xf32> to vector<256x128xf32>
    %6 = arith.mulf %4, %4 : vector<256x128xf32>
    %7 = arith.mulf %5, %5 : vector<256x128xf32>
    %8 = arith.addf %6, %7 : vector<256x128xf32>
    %c0_4 = arith.constant 0 : index
    %c0_5 = arith.constant 0 : index
    %9 = vector.load %arg4[%c0_4, %c0_5] : memref<80x256xf32, #tpu.memory_space<vmem>>, vector<80x256xf32>
    %cst_6 = arith.constant dense<0.000000e+00> : vector<80x128xf32>
    %10 = tpu.matmul %9, %8, %cst_6 {dimension_numbers = #tpu.dot_dimension_numbers<[1], [0], [0], [1], [0, 0, 1, 1], [], []>} : vector<80x256xf32>, vector<256x128xf32>, vector<80x128xf32> -> vector<80x128xf32>
    %cst_7 = arith.constant 9.99999997E-7 : f32
    %11 = vector.broadcast %cst_7 : f32 to vector<80x128xf32>
    %12 = arith.addf %10, %11 : vector<80x128xf32>
    %13 = math.log %12 : vector<80x128xf32>
    %c0_8 = arith.constant 0 : index
    %c0_9 = arith.constant 0 : index
    %c0_10 = arith.constant 0 : index
    %14 = vector.load %arg5[%c0_8, %c0_9, %c0_10] : memref<1x80x128xf32, #tpu.memory_space<vmem>>, vector<1x80x128xf32>
    %15 = vector.shape_cast %14 : vector<1x80x128xf32> to vector<80x128xf32>
    %16 = vector.shape_cast %13 : vector<80x128xf32> to vector<1x80x128xf32>
    tpu.vector_store %arg5[%c0_8, %c0_9, %c0_10], %16 {strides = array<i32>} : memref<1x80x128xf32, #tpu.memory_space<vmem>>, vector<1x80x128xf32>,
    return
  }
  func.func @transform_0(%arg0: i32, %arg1: i32) -> (i32, i32, i32) {
    %c0_i32 = arith.constant 0 : i32
    %c0_i32_0 = arith.constant 0 : i32
    return %arg0, %c0_i32, %arg1 : i32, i32, i32
  }
  func.func @transform_1(%arg0: i32, %arg1: i32) -> (i32, i32) {
    %c0_i32 = arith.constant 0 : i32
    %c0_i32_0 = arith.constant 0 : i32
    %c0_i32_1 = arith.constant 0 : i32
    return %c0_i32, %c0_i32_0 : i32, i32
  }
  func.func @transform_2(%arg0: i32, %arg1: i32) -> (i32, i32) {
    %c0_i32 = arith.constant 0 : i32
    %c0_i32_0 = arith.constant 0 : i32
    %c0_i32_1 = arith.constant 0 : i32
    return %c0_i32, %c0_i32_0 : i32, i32
  }
  func.func @transform_3(%arg0: i32, %arg1: i32) -> (i32, i32, i32) {
    %c0_i32 = arith.constant 0 : i32
    %c0_i32_0 = arith.constant 0 : i32
    return %arg0, %c0_i32, %arg1 : i32, i32, i32
  }
}

</mosaic_0001>

<bundles_post_ra>
// kernel: reverse
= control target key start
LH: loop header
LB: loop body
LE: loop exit
PB: predicated region body
PF: predicated region fallthrough
CT: control target
= control target key end

     0   :  { %v2_v0 = vlaneseq  ;;  %s311_s0 = inlined_call_operand.vmem [shape: f32[2,256], index: 0, kind: input, shape index: {}]   ;;  %s312_s1 = inlined_call_operand.vmem [shape: f32[2,256], index: 1, kind: output, shape index: {}]  }
   0x2   :  { %v3_v1 = vsub.s32 127, %v2_v0 }
   0x4   :  { %4 = vset.pattern.permute.xlu0 %v3_v1 }
   0x5   :  { %s271_s6 = smov 0   ;;  %s273_s7 = smov 0  }
   0x6   :  { %s275_s8 = smov 0  }
   0x7 LB: > { %s201_s9 = sadd.s32 4294967295, %s259_s8   ;;  %s19_s10 = sadd.s32 1, %s255_s7  ;;  %s259_s8 = sphi %s275_s8, %s10_s8   ;;  %s255_s7 = sphi %s273_s7, %s314_s7   ;;  %s251_s6 = sphi %s271_s6, %s313_s6  }
   0x8   : > { %p20_p0 = scmp.ge.s32.totalorder %s19_s10, 2  ;;  %p203_p1 = scmp.ge.s32.totalorder %s259_s8, 2 }
   0x9   : > { %s38_s11 = sand.u32 (!%p203_p1), 1, %s259_s8   ;;  %s41_s12 = ssub.s32 (!%p203_p1), 1, %s255_s7 }
   0xa   : > { %s316_s10 = smov (%p20_p0, %s19_s10), 0  ;;  %36 = sbr.rel (%p203_p1) target bundleno = 17 (0x11), region = 16 }
   0xb   : > { %s204_s13 = sshll.u32 (!%p203_p1), %s38_s11, 1  ;;  %s205_s14 = sshll.u32 (!%p203_p1), %s41_s12, 1 }
   0xc   : > { %s45_s17 = scalar_lea.vmem (!%p203_p1), %s311_s0, %s205_s14  ;;  %s40_s18 = scalar_lea.vmem (!%p203_p1), [#allocation1], %s204_s13 }
   0xd   : > { %v61_v2 = vld [vmem:[%s45_s17] sm:$0x3] (!%p203_p1) }
   0xe   : > { %62 = vst [vmem:[%s40_s18] sm:$0x3] (!%p203_p1), %v61_v2 }
  0x11 PF: > { %p206_p2 = scmp.ge.s32.totalorder %s259_s8, 1  ;;  %p78_p3 = scmp.lt.s32.totalorder %s259_s8, 3 }
  0x13   : > { %p79_p4 = pnand %p206_p2, %p78_p3 }
  0x14   : > { %s89_s19 = sand.u32 (!%p79_p4), 1, %s201_s9   ;;  %s210_s23 = sshll.u32 (!%p79_p4), %s251_s6, 1 }
  0x15   : > { %82 = sbr.rel (%p79_p4) target bundleno = 177 (0xb1), region = 50  ;;  %s207_s20 = sshll.u32 (!%p79_p4), %s89_s19, 1 }
  0x16   : > { %s91_s21 = scalar_lea.vmem (!%p79_p4), [#allocation1], %s207_s20  ;;  %s95_s22 = scalar_lea.vmem (!%p79_p4), [#allocation3], %s207_s20 }
  0x17   : > { %v98_v3 = vld [vmem:[%s91_s21] sm:$0x3] (!%p79_p4)  ;;  %s118_s26 = scalar_lea.vmem (!%p79_p4), %s312_s1, %s210_s23 }
  0x18   : > { %99 = vst [vmem:[#allocation0] sm:$0x3] (!%p79_p4), %v98_v3 }
  0x1f   : > { %v101_v4 = vld [vmem:[#allocation0] sm:$0xff] }
  0x20   : > { %102 = vperm.xlu0 %4, %v101_v4  }
  0x9f   : > { %v103_v5 = vpop.permute.xlu0 %102 }
  0xa0   : > { %104 = vst [vmem:[#allocation2] sm:$0xff] %v103_v5 }
  0xa7   : > { %v108_v6 = vld [vmem:[#allocation2] sm:$0x3] }
  0xa8   : > { %110 = vst [vmem:[%s95_s22] sm:$0x3] %v108_v6 }
  0xaf   : > { %v134_v7 = vld [vmem:[%s95_s22] sm:$0x3] }
  0xb0   : > { %135 = vst [vmem:[%s118_s26] sm:$0x3] %v134_v7 }
  0xb1 PF: > { %s10_s8 = sadd.s32 1, %s259_s8   ;;  %s313_s6 = smov %s255_s7 }
  0xb2   : > { %p7_p5 = scmp.ge.s32.totalorder %s10_s8, 4   ;;  %s314_s7 = smov %s316_s10 }
  0xb4   :  { %9 = sbr.rel (!%p7_p5) target bundleno = 7 (0x7), region = 110 }

</bundles_post_ra>
